<compile_context>
chip_gen: v6e
topology: v6e:2x2x1
jax: 0.10.0
libtpu: 0.0.40
codegen_flags: <defaults>
</compile_context>

<pallas_src>
import functools

import jax
import jax.numpy as jnp
from jax.experimental import pallas as pl
from jax.experimental.pallas import tpu as pltpu


# ----------------------------- configuration --------------------------------
class Opt:
    grid_resolution = 8          # N = grid_resolution ** 3 = 512 points
    hidden_dim = 32
    text_dim = 16
    fixed_rotations = 1.0
    fixed_scales = -5.0


SH_DEGREE = 0
IMG_CHANNEL = 3 + 1 + 4 + 3 + 3 * (SH_DEGREE + 1) ** 2   # = 14
C_PAD = 16        # output channels padded 14 -> 16 (unmasked (8,128) writeback)
XYZ_PAD = 8       # xyz coord dim padded 3 -> 8; row 3 = ones (carries the bias)
DC_ROWS = 8       # sigmoid epilogue emitted for channel rows 0..7 (rows 1:4 used)


# ------------------------------- Pallas kernel ------------------------------
def generator_kernel(xyzT_ref, w1x_aug_ref, w2T_ref, b2T_ref,
                     propT_ref, dcT_ref, *, batch):
    """Whole Generator MLP in one grid step, computed transposed.

    per batch b (static unroll):
      hT      = relu(W1aug[b] @ xyz_aug^T)          # (H, N); bias rides column 3
      propT   = W2^T @ hT + b2^T                    # (C_PAD, N) lane-dense store
      dcT     = 3.545*sigmoid(propT[0:8]) - 1.7725  # fused EUP epilogue
    """
    xyzT = xyzT_ref[...]                                       # (XYZ_PAD, N)
    w2T = w2T_ref[...]                                         # (C_PAD, H)
    b2T = b2T_ref[...]                                         # (C_PAD, 1)
    for b in range(batch):                                     # B=2, static unroll
        hT = jnp.maximum(
            jnp.dot(w1x_aug_ref[b], xyzT, preferred_element_type=jnp.float32),
            0.0)                                               # (H, N)
        outT = jnp.dot(w2T, hT, preferred_element_type=jnp.float32) + b2T
        propT_ref[b] = outT                                    # (C_PAD, N)
        # fused features_dc epilogue; first sublane group only (rows 0:8 is an
        # aligned (8,128) vreg slice), downstream uses rows 1:4.
        head = outT[0:DC_ROWS, :]
        dcT_ref[b] = 3.545 / (1.0 + jnp.exp(-head)) - 1.7725   # (DC_ROWS, N)


# ------------------------- one-off layout plumbing ---------------------------
def prepare_generator_constants(xyz, params):
    """Pad/transpose the static operands ONCE at init (not in the jitted path)."""
    N = xyz.shape[0]
    H = params["w1t"].shape[1]
    C = params["w2"].shape[1]
    assert N % 128 == 0, "point count must be a multiple of 128 (lane dim)"
    assert C <= C_PAD

    # points on lanes; coord dim padded 3 -> 8, row 3 = ones to carry the bias
    xyzT = jnp.zeros((XYZ_PAD, N), jnp.float32)
    xyzT = xyzT.at[:3, :].set(xyz.T)
    xyzT = xyzT.at[3, :].set(1.0)
    # transposed first-layer weight; padded rows of xyz^T meet zero columns
    w1xT = jnp.zeros((H, XYZ_PAD), jnp.float32).at[:, :3].set(params["w1x"].T)
    # transposed second layer, channel dim padded 14 -> 16 with zeros
    w2T = jnp.zeros((C_PAD, H), jnp.float32).at[:C, :].set(params["w2"].T)
    b2T = jnp.zeros((C_PAD, 1), jnp.float32).at[:C, :].set(params["b2"].T)
    return {"xyzT": xyzT, "w1xT": w1xT, "w2T": w2T, "b2T": b2T,
            "w1t": params["w1t"], "b1": params["b1"]}


# ------------------------------- hot path ------------------------------------
def run_generator(text_zs, consts):
    """text_zs: (B, T) f32 -> (propT (B, C_PAD, N), dcT (B, DC_ROWS, N))."""
    B = text_zs.shape[0]
    H = consts["w1xT"].shape[0]
    N = consts["xyzT"].shape[1]

    # fold the per-batch text bias into column 3 of the augmented layer-1 weight
    b1_eff = text_zs @ consts["w1t"] + consts["b1"]            # (B, H)
    w1x_aug = jnp.broadcast_to(consts["w1xT"], (B, H, XYZ_PAD))
    w1x_aug = w1x_aug.at[:, :, 3].set(b1_eff)                  # (B, H, XYZ_PAD)

    flops = 2 * B * N * H * (XYZ_PAD + C_PAD)
    bytes_accessed = 4 * (XYZ_PAD * N + B * H * XYZ_PAD + C_PAD * H + C_PAD
                          + B * C_PAD * N + B * DC_ROWS * N)

    propT, dcT = pl.pallas_call(
        functools.partial(generator_kernel, batch=B),
        out_shape=(
            jax.ShapeDtypeStruct((B, C_PAD, N), jnp.float32),
            jax.ShapeDtypeStruct((B, DC_ROWS, N), jnp.float32),
        ),
        grid_spec=pltpu.PrefetchScalarGridSpec(
            num_scalar_prefetch=0,
            grid=(1,),                                          # single step
            in_specs=[
                pl.BlockSpec((XYZ_PAD, N),      lambda i: (0, 0)),      # xyz^T
                pl.BlockSpec((B, H, XYZ_PAD),   lambda i: (0, 0, 0)),   # W1aug
                pl.BlockSpec((C_PAD, H),        lambda i: (0, 0)),      # W2^T
                pl.BlockSpec((C_PAD, 1),        lambda i: (0, 0)),      # b2^T
            ],
            out_specs=[
                pl.BlockSpec((B, C_PAD, N),     lambda i: (0, 0, 0)),   # props^T
                pl.BlockSpec((B, DC_ROWS, N),   lambda i: (0, 0, 0)),   # dc^T
            ],
        ),
        compiler_params=pltpu.CompilerParams(
            dimension_semantics=("arbitrary",)),
        cost_estimate=pl.CostEstimate(
            flops=flops,
            transcendentals=B * DC_ROWS * N,
            bytes_accessed=bytes_accessed),
    )(consts["xyzT"], w1x_aug, consts["w2T"], consts["b2T"])
    return propT, dcT


@jax.jit
def _generator_props(text_zs, consts):
    return run_generator(text_zs, consts)


# ------------------------------ DreamInit glue -------------------------------
def make_xyz_grid(grid_resolution, bound=1.0):
    # matches torch.arange(-bound, bound, 2*bound/res) + meshgrid(indexing='ij')
    coords = jnp.arange(grid_resolution, dtype=jnp.float32) * (
        2.0 * bound / grid_resolution) - bound
    g = jnp.stack(jnp.meshgrid(coords, coords, coords, indexing="ij"), axis=3)
    return g.reshape(-1, 3)


def init_params(key, text_dim, hidden_dim, out_channels):
    k1, k2, k3, k4, k5 = jax.random.split(key, 5)
    scale = 0.1
    return {
        "w1x": jax.random.normal(k1, (3, hidden_dim), jnp.float32) * scale,
        "w1t": jax.random.normal(k2, (text_dim, hidden_dim), jnp.float32) * scale,
        "b1":  jax.random.normal(k3, (1, hidden_dim), jnp.float32) * scale,
        "w2":  jax.random.normal(k4, (hidden_dim, out_channels), jnp.float32) * scale,
        "b2":  jax.random.normal(k5, (1, out_channels), jnp.float32) * scale,
    }


def dream_init_gaussian_generate(text_zs, xyz, consts, opt):
    """Mirrors DreamInit.gaussian_generate (training branch of the Generator)."""
    B = text_zs.shape[0]
    N = xyz.shape[0]

    propT, dcT = _generator_props(text_zs, consts)   # channel-major, lane-dense

    gaussians = []
    for i in range(B):
        opacity = propT[i, 0, :, None]                                 # (N, 1)
        rotation = jnp.tile(
            jnp.array([opt.fixed_rotations, 0.0, 0.0, 0.0], jnp.float32),
            (N, 1))                                                    # (N, 4)
        scaling = jnp.tile(
            jnp.array([opt.fixed_scales] * 3, jnp.float32), (N, 1))    # (N, 3)
        fdc = dcT[i, 1:4, :].T.reshape(-1, 1, 3)                       # (N, 1, 3)
        # TODO(synk): original code does gaussians_property[i,:,4:].reshape(-1,15,3),
        # which is inconsistent with sh_degree=0 (only 10 trailing channels); kept raw.
        frest = propT[i, 4:IMG_CHANNEL, :].T                           # (N, 10)
        gaussians.append({
            "_xyz": xyz,
            "_opacity": opacity,
            "_rotation": rotation,
            "_scaling": scaling,
            "_features_dc": fdc,
            "_features_rest": frest,
        })
    return gaussians, propT, dcT


def dream_init_forward(text_zs, xyz, consts, opt):
    gaussians, propT, dcT = dream_init_gaussian_generate(text_zs, xyz, consts, opt)
    # TODO(synk): gsplat `rasterization` (differentiable 3D gaussian splatting
    # renderer) has no clean Pallas equivalent; rendering is not translated.
    # TODO(synk): Generator's eval-mode `all_top_k_indices` depends on its
    # (undefined) internals and is not reproduced.
    return gaussians, propT, dcT


# ----------------------------- reference check -------------------------------
def reference_generator(xyz, text_zs, params):
    h = xyz @ params["w1x"] + (text_zs @ params["w1t"])[:, None, :] + params["b1"]
    h = jnp.maximum(h, 0.0)
    out = h @ params["w2"] + params["b2"]
    dc = 3.545 * jax.nn.sigmoid(out[:, :, 1:4]) - 1.7725
    return out, dc


if __name__ == "__main__":
    opt = Opt()
    key = jax.random.PRNGKey(0)
    k_text, k_params = jax.random.split(key)

    B = 2
    text_zs = jax.random.normal(k_text, (B, opt.text_dim), jnp.float32)
    xyz = make_xyz_grid(opt.grid_resolution)                # (512, 3)
    params = init_params(k_params, opt.text_dim, opt.hidden_dim, IMG_CHANNEL)
    consts = prepare_generator_constants(xyz, params)       # one-off, outside jit

    gaussians, propT, dcT = dream_init_forward(text_zs, xyz, consts, opt)
    propT = jax.block_until_ready(propT)
    dcT = jax.block_until_ready(dcT)

    # correctness check vs. pure-JAX reference (layout change is test-only)
    ref_props, ref_dc = reference_generator(xyz, text_zs, params)
    props_bnc = jnp.transpose(propT[:, :IMG_CHANNEL, :], (0, 2, 1))   # (B, N, C)
    dc_bnc = jnp.transpose(dcT[:, 1:4, :], (0, 2, 1))                 # (B, N, 3)
    assert jnp.allclose(props_bnc, ref_props, atol=1e-4, rtol=1e-4)
    assert jnp.allclose(dc_bnc, ref_dc, atol=1e-4, rtol=1e-4)
    for i in range(B):
        assert jnp.allclose(
            gaussians[i]["_features_dc"].reshape(-1, 3),
            ref_dc[i], atol=1e-4, rtol=1e-4)
        assert gaussians[i]["_opacity"].shape == (xyz.shape[0], 1)
        assert gaussians[i]["_rotation"].shape == (xyz.shape[0], 4)
        assert gaussians[i]["_scaling"].shape == (xyz.shape[0], 3)
        assert gaussians[i]["_features_rest"].shape == (xyz.shape[0], IMG_CHANNEL - 4)

    print("KERNEL_OK")
</pallas_src>

<mosaic_0001>
module attributes {stable_mosaic.version = 11 : i64} {
  func.func @generator_kernel(%arg0: i32, %arg1: memref<8x512xf32, #tpu.memory_space<vmem>>, %arg2: memref<2x32x8xf32, #tpu.memory_space<vmem>>, %arg3: memref<16x32xf32, #tpu.memory_space<vmem>>, %arg4: memref<16x1xf32, #tpu.memory_space<vmem>>, %arg5: memref<2x16x512xf32, #tpu.memory_space<vmem>>, %arg6: memref<2x8x512xf32, #tpu.memory_space<vmem>>) attributes {dimension_semantics = [#tpu.dimension_semantics<arbitrary>], iteration_bounds = array<i64: 1>, scalar_prefetch = 0 : i64, scratch_operands = 0 : i64, tpu.core_type = #tpu.core_type<tc>, window_params = [{pipeline_mode = #tpu.pipeline_mode<synchronous>, transform_indices = @transform_0, window_bounds = array<i64: 8, 512>}, {pipeline_mode = #tpu.pipeline_mode<synchronous>, transform_indices = @transform_1, window_bounds = array<i64: 2, 32, 8>}, {pipeline_mode = #tpu.pipeline_mode<synchronous>, transform_indices = @transform_2, window_bounds = array<i64: 16, 32>}, {pipeline_mode = #tpu.pipeline_mode<synchronous>, transform_indices = @transform_3, window_bounds = array<i64: 16, 1>}, {pipeline_mode = #tpu.pipeline_mode<synchronous>, transform_indices = @transform_4, window_bounds = array<i64: 2, 16, 512>}, {pipeline_mode = #tpu.pipeline_mode<synchronous>, transform_indices = @transform_5, window_bounds = array<i64: 2, 8, 512>}]} {
    %c0 = arith.constant 0 : index
    %c0_0 = arith.constant 0 : index
    %0 = vector.load %arg1[%c0, %c0_0] : memref<8x512xf32, #tpu.memory_space<vmem>>, vector<8x512xf32>
    %c0_1 = arith.constant 0 : index
    %c0_2 = arith.constant 0 : index
    %1 = vector.load %arg3[%c0_1, %c0_2] : memref<16x32xf32, #tpu.memory_space<vmem>>, vector<16x32xf32>
    %c0_3 = arith.constant 0 : index
    %c0_4 = arith.constant 0 : index
    %2 = vector.load %arg4[%c0_3, %c0_4] : memref<16x1xf32, #tpu.memory_space<vmem>>, vector<16x1xf32>
    %c0_5 = arith.constant 0 : index
    %c0_6 = arith.constant 0 : index
    %c0_7 = arith.constant 0 : index
    %3 = vector.load %arg2[%c0_5, %c0_6, %c0_7] : memref<2x32x8xf32, #tpu.memory_space<vmem>>, vector<1x32x8xf32>
    %4 = vector.shape_cast %3 : vector<1x32x8xf32> to vector<32x8xf32>
    %cst = arith.constant dense<0.000000e+00> : vector<32x512xf32>
    %5 = tpu.matmul %4, %0, %cst {dimension_numbers = #tpu.dot_dimension_numbers<[1], [0], [0], [1], [0, 0, 1, 1], [], []>} : vector<32x8xf32>, vector<8x512xf32>, vector<32x512xf32> -> vector<32x512xf32>
    %cst_8 = arith.constant 0.000000e+00 : f32
    %6 = vector.broadcast %cst_8 : f32 to vector<32x512xf32>
    %7 = arith.maximumf %5, %6 : vector<32x512xf32>
    %cst_9 = arith.constant dense<0.000000e+00> : vector<16x512xf32>
    %8 = tpu.matmul %1, %7, %cst_9 {dimension_numbers = #tpu.dot_dimension_numbers<[1], [0], [0], [1], [0, 0, 1, 1], [], []>} : vector<16x32xf32>, vector<32x512xf32>, vector<16x512xf32> -> vector<16x512xf32>
    %9 = vector.broadcast %2 : vector<16x1xf32> to vector<16x512xf32>
    %10 = arith.addf %8, %9 : vector<16x512xf32>
    %c0_10 = arith.constant 0 : index
    %c0_11 = arith.constant 0 : index
    %c0_12 = arith.constant 0 : index
    %11 = vector.load %arg5[%c0_10, %c0_11, %c0_12] : memref<2x16x512xf32, #tpu.memory_space<vmem>>, vector<1x16x512xf32>
    %12 = vector.shape_cast %11 : vector<1x16x512xf32> to vector<16x512xf32>
    %13 = vector.shape_cast %10 : vector<16x512xf32> to vector<1x16x512xf32>
    tpu.vector_store %arg5[%c0_10, %c0_11, %c0_12], %13 {strides = array<i32>} : memref<2x16x512xf32, #tpu.memory_space<vmem>>, vector<1x16x512xf32>,
    %14 = vector.extract_strided_slice %10 {offsets = [0, 0], sizes = [8, 512], strides = [1, 1]} : vector<16x512xf32> to vector<8x512xf32>
    %cst_13 = arith.constant 0.000000e+00 : f32
    %15 = vector.broadcast %cst_13 : f32 to vector<8x512xf32>
    %16 = arith.subf %15, %14 : vector<8x512xf32>
    %17 = math.exp %16 : vector<8x512xf32>
    %cst_14 = arith.constant 1.000000e+00 : f32
    %18 = vector.broadcast %cst_14 : f32 to vector<8x512xf32>
    %19 = arith.addf %18, %17 : vector<8x512xf32>
    %cst_15 = arith.constant 3.545000e+00 : f32
    %20 = vector.broadcast %cst_15 : f32 to vector<8x512xf32>
    %21 = arith.divf %20, %19 : vector<8x512xf32>
    %cst_16 = arith.constant 1.772500e+00 : f32
    %22 = vector.broadcast %cst_16 : f32 to vector<8x512xf32>
    %23 = arith.subf %21, %22 : vector<8x512xf32>
    %c0_17 = arith.constant 0 : index
    %c0_18 = arith.constant 0 : index
    %c0_19 = arith.constant 0 : index
    %24 = vector.load %arg6[%c0_17, %c0_18, %c0_19] : memref<2x8x512xf32, #tpu.memory_space<vmem>>, vector<1x8x512xf32>
    %25 = vector.shape_cast %24 : vector<1x8x512xf32> to vector<8x512xf32>
    %26 = vector.shape_cast %23 : vector<8x512xf32> to vector<1x8x512xf32>
    tpu.vector_store %arg6[%c0_17, %c0_18, %c0_19], %26 {strides = array<i32>} : memref<2x8x512xf32, #tpu.memory_space<vmem>>, vector<1x8x512xf32>,
    %c1 = arith.constant 1 : index
    %c0_20 = arith.constant 0 : index
    %c0_21 = arith.constant 0 : index
    %27 = vector.load %arg2[%c1, %c0_20, %c0_21] : memref<2x32x8xf32, #tpu.memory_space<vmem>>, vector<1x32x8xf32>
    %28 = vector.shape_cast %27 : vector<1x32x8xf32> to vector<32x8xf32>
    %cst_22 = arith.constant dense<0.000000e+00> : vector<32x512xf32>
    %29 = tpu.matmul %28, %0, %cst_22 {dimension_numbers = #tpu.dot_dimension_numbers<[1], [0], [0], [1], [0, 0, 1, 1], [], []>} : vector<32x8xf32>, vector<8x512xf32>, vector<32x512xf32> -> vector<32x512xf32>
    %cst_23 = arith.constant 0.000000e+00 : f32
    %30 = vector.broadcast %cst_23 : f32 to vector<32x512xf32>
    %31 = arith.maximumf %29, %30 : vector<32x512xf32>
    %cst_24 = arith.constant dense<0.000000e+00> : vector<16x512xf32>
    %32 = tpu.matmul %1, %31, %cst_24 {dimension_numbers = #tpu.dot_dimension_numbers<[1], [0], [0], [1], [0, 0, 1, 1], [], []>} : vector<16x32xf32>, vector<32x512xf32>, vector<16x512xf32> -> vector<16x512xf32>
    %33 = vector.broadcast %2 : vector<16x1xf32> to vector<16x512xf32>
    %34 = arith.addf %32, %33 : vector<16x512xf32>
    %c1_25 = arith.constant 1 : index
    %c0_26 = arith.constant 0 : index
    %c0_27 = arith.constant 0 : index
    %35 = vector.load %arg5[%c1_25, %c0_26, %c0_27] : memref<2x16x512xf32, #tpu.memory_space<vmem>>, vector<1x16x512xf32>
    %36 = vector.shape_cast %35 : vector<1x16x512xf32> to vector<16x512xf32>
    %37 = vector.shape_cast %34 : vector<16x512xf32> to vector<1x16x512xf32>
    tpu.vector_store %arg5[%c1_25, %c0_26, %c0_27], %37 {strides = array<i32>} : memref<2x16x512xf32, #tpu.memory_space<vmem>>, vector<1x16x512xf32>,
    %38 = vector.extract_strided_slice %34 {offsets = [0, 0], sizes = [8, 512], strides = [1, 1]} : vector<16x512xf32> to vector<8x512xf32>
    %cst_28 = arith.constant 0.000000e+00 : f32
    %39 = vector.broadcast %cst_28 : f32 to vector<8x512xf32>
    %40 = arith.subf %39, %38 : vector<8x512xf32>
    %41 = math.exp %40 : vector<8x512xf32>
    %cst_29 = arith.constant 1.000000e+00 : f32
    %42 = vector.broadcast %cst_29 : f32 to vector<8x512xf32>
    %43 = arith.addf %42, %41 : vector<8x512xf32>
    %cst_30 = arith.constant 3.545000e+00 : f32
    %44 = vector.broadcast %cst_30 : f32 to vector<8x512xf32>
    %45 = arith.divf %44, %43 : vector<8x512xf32>
    %cst_31 = arith.constant 1.772500e+00 : f32
    %46 = vector.broadcast %cst_31 : f32 to vector<8x512xf32>
    %47 = arith.subf %45, %46 : vector<8x512xf32>
    %c1_32 = arith.constant 1 : index
    %c0_33 = arith.constant 0 : index
    %c0_34 = arith.constant 0 : index
    %48 = vector.load %arg6[%c1_32, %c0_33, %c0_34] : memref<2x8x512xf32, #tpu.memory_space<vmem>>, vector<1x8x512xf32>
    %49 = vector.shape_cast %48 : vector<1x8x512xf32> to vector<8x512xf32>
    %50 = vector.shape_cast %47 : vector<8x512xf32> to vector<1x8x512xf32>
    tpu.vector_store %arg6[%c1_32, %c0_33, %c0_34], %50 {strides = array<i32>} : memref<2x8x512xf32, #tpu.memory_space<vmem>>, vector<1x8x512xf32>,
    return
  }
  func.func @transform_0(%arg0: i32) -> (i32, i32) {
    %c0_i32 = arith.constant 0 : i32
    %c0_i32_0 = arith.constant 0 : i32
    %c0_i32_1 = arith.constant 0 : i32
    return %c0_i32, %c0_i32_0 : i32, i32
  }
  func.func @transform_1(%arg0: i32) -> (i32, i32, i32) {
    %c0_i32 = arith.constant 0 : i32
    %c0_i32_0 = arith.constant 0 : i32
    %c0_i32_1 = arith.constant 0 : i32
    %c0_i32_2 = arith.constant 0 : i32
    return %c0_i32, %c0_i32_0, %c0_i32_1 : i32, i32, i32
  }
  func.func @transform_2(%arg0: i32) -> (i32, i32) {
    %c0_i32 = arith.constant 0 : i32
    %c0_i32_0 = arith.constant 0 : i32
    %c0_i32_1 = arith.constant 0 : i32
    return %c0_i32, %c0_i32_0 : i32, i32
  }
  func.func @transform_3(%arg0: i32) -> (i32, i32) {
    %c0_i32 = arith.constant 0 : i32
    %c0_i32_0 = arith.constant 0 : i32
    %c0_i32_1 = arith.constant 0 : i32
    return %c0_i32, %c0_i32_0 : i32, i32
  }
  func.func @transform_4(%arg0: i32) -> (i32, i32, i32) {
    %c0_i32 = arith.constant 0 : i32
    %c0_i32_0 = arith.constant 0 : i32
    %c0_i32_1 = arith.constant 0 : i32
    %c0_i32_2 = arith.constant 0 : i32
    return %c0_i32, %c0_i32_0, %c0_i32_1 : i32, i32, i32
  }
  func.func @transform_5(%arg0: i32) -> (i32, i32, i32) {
    %c0_i32 = arith.constant 0 : i32
    %c0_i32_0 = arith.constant 0 : i32
    %c0_i32_1 = arith.constant 0 : i32
    %c0_i32_2 = arith.constant 0 : i32
    return %c0_i32, %c0_i32_0, %c0_i32_1 : i32, i32, i32
  }
}

</mosaic_0001>

<bundles_post_ra>
// kernel: _generator_props.1
= control target key start
LH: loop header
LB: loop body
LE: loop exit
PB: predicated region body
PF: predicated region fallthrough
CT: control target
= control target key end

     0   :  { %11 = vsyncpa [#allocation3], 0  ;;  %vm33_vm0 = vcmask 64512   ;;  %v1009_v5 = vmov 0.0   ;;  %s1201_s0 = inlined_call_operand.vmem [shape: f32[8,512], index: 0, kind: input, shape index: {}]   ;;  %s1202_s1 = inlined_call_operand.vmem [shape: f32[2,32,8], index: 1, kind: input, shape index: {}]   ;;  %s1203_s2 = inlined_call_operand.vmem [shape: f32[16,32], index: 2, kind: input, shape index: {}]   ;;  %s1204_s3 = inlined_call_operand.vmem [shape: f32[16,1], index: 3, kind: input, shape index: {}]   ;;  %s1205_s4 = inlined_call_operand.hbm [shape: f32[2,16,512], index: 4, kind: output, shape index: {0}]   ;;  %s1206_s5 = inlined_call_operand.hbm [shape: f32[2,8,512], index: 5, kind: output, shape index: {1}]  }
   0x1   :  { %v1048_v0 = vld [vmem:[%s1201_s0 + $0x8] sm:$0xff]  ;;  %v1053_v1 = vld [vmem:[%s1201_s0 + $0x18] sm:$0xff]  ;;  %v1058_v2 = vld [vmem:[%s1201_s0] sm:$0xff]  ;;  %110 = vmatprep.mubr.f32.mxu0 %v1009_v5 }
   0x2   :  { %76 = vmatprep.subr.mxu0 %v1048_v0  ;;  %165 = vmatprep.subr.mxu1 %v1053_v1  ;;  %v1065_v3 = vld [vmem:[%s1201_s0 + $0x10] sm:$0xff]  ;;  %v29_v4 = vld [vmem:[%s1202_s1] sm:$0xff] }
   0x3   :  { %77 = vmatpush1.msra.mxu0 %v1058_v2 }
   0x4   :  { %12 = vsyncpa [#allocation5], 0  ;;  %166 = vmatpush1.msra.mxu1 %v1065_v3  ;;  %199 = vmatprep.mubr.f32.mxu1 %v1009_v5  ;;  %v30_v6 = vld [vmem:[%s1202_s1 + $0x8] sm:$0xff]  ;;  %v31_v7 = vld [vmem:[%s1202_s1 + $0x10] sm:$0xff]  ;;  %v1010_v10 = vmov 0   ;;  %vm250_vm1 = vcmask 261120  }
   0x5   :  { %890 = vmatmul.mubr.msk.f32.vlgmr.msra.gmra.mxu0 %vm33_vm0, %v29_v4  ;;  %894 = vmatmul.mubr.msk.f32.vlgmr.msra.gmra.mxu1 %vm33_vm0, %v29_v4  ;;  %v32_v8 = vld [vmem:[%s1202_s1 + $0x18] sm:$0xff]  ;;  %v27_v9 = vld [vmem:[%s1204_s3] sm:$0xff]  ;;  %v28_v11 = vld [vmem:[%s1204_s3 + $0x8] sm:$0xff] }
   0x6   :  { %116 = vmatprep.mubr.f32.mxu0 %v1009_v5  ;;  %205 = vmatprep.mubr.f32.mxu1 %v1009_v5  ;;  %v1108_v44 = vld [vmem:[%s1203_s2] sm:$0xff]  ;;  %v1119_v45 = vld [vmem:[%s1203_s2 + $0x8] sm:$0xff]  ;;  %v908_v48 = vld [vmem:[%s1202_s1 + $0x30] sm:$0xff] }
   0x7   :  { %932 = vset.pattern.permute.xlu0 %v1010_v10  ;;  %v906_v46 = vld [vmem:[%s1202_s1 + $0x20] sm:$0xff]  ;;  %v907_v47 = vld [vmem:[%s1202_s1 + $0x28] sm:$0xff]  ;;  %v909_v49 = vld [vmem:[%s1202_s1 + $0x38] sm:$0xff]  ;;  %s1011_s1 = smov [#allocation2]  }
   0x8   :  { %242 = vperm.xlu0 %932, %v27_v9   ;;  %s863_s22 = sshll.u32 %s1011_s1, 4  ;;  %s864_s22 = int_to_ptr.vmem [resolvable:$true] %s863_s22 }
   0x9   :  { %891 = vmatmul.mubr.msk.f32.gmra.mxu0 %vm33_vm0, %v30_v6  ;;  %895 = vmatmul.mubr.msk.f32.gmra.mxu1 %vm33_vm0, %v30_v6  ;;  %s965_s23 = scalar_lea.vmem %s864_s22, 2048  ;;  %p970_p1 = scmp.lt.s32.totalorder %s864_s22, %s864_s22 }
   0xa   :  { %122 = vmatprep.mubr.f32.mxu0 %v1009_v5  ;;  %211 = vmatprep.mubr.f32.mxu1 %v1009_v5  ;;  %p966_p0 = scmp.ne.s32.totalorder %s864_s22, %s965_s23  ;;  %p971_p2 = scmp.lt.s32.totalorder %s965_s23, %s965_s23 }
   0xc   :  { %247 = vperm.xlu0 %932, %v28_v11   ;;  %p972_p3 = por %p971_p2, %p970_p1 }
   0xd   :  { %892 = vmatmul.mubr.msk.f32.gmra.mxu0 %vm33_vm0, %v31_v7  ;;  %896 = vmatmul.mubr.msk.f32.gmra.mxu1 %vm33_vm0, %v31_v7 }
   0xe   :  { %128 = vmatprep.mubr.f32.mxu0 %v1009_v5  ;;  %217 = vmatprep.mubr.f32.mxu1 %v1009_v5  ;;  %p973_p4 = pnand %p972_p3, %p966_p0 }
  0x11   :  { %893 = vmatmul.mubr.msk.f32.gmra.mxu0 %vm33_vm0, %v32_v8  ;;  %897 = vmatmul.mubr.msk.f32.gmra.mxu1 %vm33_vm0, %v32_v8 }
  0x12   :  { %321 = vmatprep.mubr.f32.mxu0 %v1009_v5  ;;  %398 = vmatprep.mubr.f32.mxu1 %v1009_v5 }
  0x83   :  { %v1159_v50 = vpop.permute.xlu0 %242 }
  0x87   :  { %v1165_v61 = vpop.permute.xlu0 %247 }
  0xc5   :  { %v112_v12 = vpop.f32.mrf.mxu0  ;;  %v201_v13 = vpop.f32.mrf.mxu1 }
  0xc6   :  { %v224_v42 = vmax.f32 %v112_v12, 0.0  ;;  %v226_v43 = vmax.f32 %v201_v13, 0.0 }
  0xc7   :  { %v114_v14 = vpop.f32.mrf.mxu0  ;;  %v203_v15 = vpop.f32.mrf.mxu1 }
  0xc8   :  { %v225_v40 = vmax.f32 %v114_v14, 0.0  ;;  %v227_v41 = vmax.f32 %v203_v15, 0.0 }
  0xc9   :  { %v118_v16 = vpop.f32.mrf.mxu0  ;;  %v207_v17 = vpop.f32.mrf.mxu1 }
  0xca   :  { %v228_v38 = vmax.f32 %v118_v16, 0.0  ;;  %v230_v39 = vmax.f32 %v207_v17, 0.0 }
  0xcb   :  { %v120_v18 = vpop.f32.mrf.mxu0  ;;  %v209_v19 = vpop.f32.mrf.mxu1 }
  0xcc   :  { %v229_v36 = vmax.f32 %v120_v18, 0.0  ;;  %v231_v37 = vmax.f32 %v209_v19, 0.0 }
  0xcd   :  { %v124_v20 = vpop.f32.mrf.mxu0  ;;  %v213_v21 = vpop.f32.mrf.mxu1 }
  0xce   :  { %v232_v34 = vmax.f32 %v124_v20, 0.0  ;;  %v234_v35 = vmax.f32 %v213_v21, 0.0 }
  0xcf   :  { %v126_v22 = vpop.f32.mrf.mxu0  ;;  %v215_v23 = vpop.f32.mrf.mxu1 }
  0xd0   :  { %v233_v32 = vmax.f32 %v126_v22, 0.0  ;;  %v235_v33 = vmax.f32 %v215_v23, 0.0 }
  0xd1   :  { %v130_v24 = vpop.f32.mrf.mxu0  ;;  %v219_v25 = vpop.f32.mrf.mxu1 }
  0xd2   :  { %v236_v30 = vmax.f32 %v130_v24, 0.0  ;;  %v238_v31 = vmax.f32 %v219_v25, 0.0 }
  0xd3   :  { %v132_v26 = vpop.f32.mrf.mxu0  ;;  %v221_v27 = vpop.f32.mrf.mxu1 }
  0xd4   :  { %v237_v28 = vmax.f32 %v132_v26, 0.0  ;;  %v239_v29 = vmax.f32 %v221_v27, 0.0 }
  0xd6   :  { %281 = vmatprep.subr.mxu0 %v237_v28  ;;  %358 = vmatprep.subr.mxu1 %v239_v29 }
  0xd7   :  { %282 = vmatpush1.msra.mxu0 %v236_v30  ;;  %359 = vmatpush1.msra.mxu1 %v238_v31 }
  0xd8   :  { %283 = vmatprep.subr.mxu0 %v233_v32  ;;  %360 = vmatprep.subr.mxu1 %v235_v33 }
  0xd9   :  { %284 = vmatpush1.msra.mxu0 %v232_v34  ;;  %361 = vmatpush1.msra.mxu1 %v234_v35 }
  0xda   :  { %285 = vmatprep.subr.mxu0 %v229_v36  ;;  %362 = vmatprep.subr.mxu1 %v231_v37 }
  0xdb   :  { %286 = vmatpush1.msra.mxu0 %v228_v38  ;;  %363 = vmatpush1.msra.mxu1 %v230_v39 }
  0xdc   :  { %287 = vmatprep.subr.mxu0 %v225_v40  ;;  %364 = vmatprep.subr.mxu1 %v227_v41 }
  0xdd   :  { %288 = vmatpush1.msra.mxu0 %v224_v42  ;;  %365 = vmatpush1.msra.mxu1 %v226_v43 }
  0xde   :  { %898 = vmatmul.mubr.msk.f32.vlgmr.msra.gmra.mxu0 %vm250_vm1, %v1108_v44  ;;  %900 = vmatmul.mubr.msk.f32.vlgmr.msra.gmra.mxu1 %vm250_vm1, %v1108_v44 }
  0xdf   :  { %327 = vmatprep.mubr.f32.mxu0 %v1009_v5  ;;  %404 = vmatprep.mubr.f32.mxu1 %v1009_v5 }
  0xe0   :  { %498 = vmatprep.subr.mxu0 %v1048_v0  ;;  %587 = vmatprep.subr.mxu1 %v1053_v1 }
  0xe1   :  { %499 = vmatpush1.msra.mxu0 %v1058_v2  ;;  %588 = vmatpush1.msra.mxu1 %v1065_v3 }
  0xe2   :  { %899 = vmatmul.mubr.msk.f32.gmra.mxu0 %vm250_vm1, %v1119_v45  ;;  %901 = vmatmul.mubr.msk.f32.gmra.mxu1 %vm250_vm1, %v1119_v45 }
  0xe3   :  { %532 = vmatprep.mubr.f32.mxu0 %v1009_v5  ;;  %621 = vmatprep.mubr.f32.mxu1 %v1009_v5 }
  0xe6   :  { %910 = vmatmul.mubr.msk.f32.vlgmr.msra.gmra.mxu0 %vm33_vm0, %v906_v46  ;;  %914 = vmatmul.mubr.msk.f32.vlgmr.msra.gmra.mxu1 %vm33_vm0, %v906_v46 }
  0xe7   :  { %538 = vmatprep.mubr.f32.mxu0 %v1009_v5  ;;  %627 = vmatprep.mubr.f32.mxu1 %v1009_v5 }
  0xea   :  { %911 = vmatmul.mubr.msk.f32.gmra.mxu0 %vm33_vm0, %v907_v47  ;;  %915 = vmatmul.mubr.msk.f32.gmra.mxu1 %vm33_vm0, %v907_v47 }
  0xeb   :  { %544 = vmatprep.mubr.f32.mxu0 %v1009_v5  ;;  %633 = vmatprep.mubr.f32.mxu1 %v1009_v5 }
  0xee   :  { %912 = vmatmul.mubr.msk.f32.gmra.mxu0 %vm33_vm0, %v908_v48  ;;  %916 = vmatmul.mubr.msk.f32.gmra.mxu1 %vm33_vm0, %v908_v48 }
  0xef   :  { %550 = vmatprep.mubr.f32.mxu0 %v1009_v5  ;;  %639 = vmatprep.mubr.f32.mxu1 %v1009_v5 }
  0xf2   :  { %913 = vmatmul.mubr.msk.f32.gmra.mxu0 %vm33_vm0, %v909_v49  ;;  %917 = vmatmul.mubr.msk.f32.gmra.mxu1 %vm33_vm0, %v909_v49 }
  0xf3   :  { %726 = vmatprep.mubr.f32.mxu0 %v1009_v5  ;;  %803 = vmatprep.mubr.f32.mxu1 %v1009_v5 }
 0x19e   :  { %v323_v51 = vpop.f32.mrf.mxu0  ;;  %v400_v52 = vpop.f32.mrf.mxu1 }
 0x19f   :  { %v324_v53 = vadd.f32 %v323_v51, %v1159_v50  ;;  %v401_v54 = vadd.f32 %v400_v52, %v1159_v50 }
 0x1a0   :  { %v325_v55 = vpop.f32.mrf.mxu0  ;;  %v402_v56 = vpop.f32.mrf.mxu1 }
 0x1a1   :  { %411 = vst [vmem:[#allocation2] sm:$0xff] %v324_v53  ;;  %v419_v57 = vsub.f32 0.0, %v324_v53  ;;  %413 = vst [vmem:[#allocation2 + $0x10] sm:$0xff] %v401_v54  ;;  %v421_v58 = vsub.f32 0.0, %v401_v54  ;;  %v326_v59 = vadd.f32 %v325_v55, %v1159_v50  ;;  %v403_v60 = vadd.f32 %v402_v56, %v1159_v50 }
 0x1a2   :  { %v329_v62 = vpop.f32.mrf.mxu0  ;;  %v406_v63 = vpop.f32.mrf.mxu1 }
 0x1a3   :  { %v423_v0 = vmul.f32 1.442695, %v419_v57  ;;  %v427_v1 = vmul.f32 1.442695, %v421_v58  ;;  %412 = vst [vmem:[#allocation2 + $0x8] sm:$0xff] %v326_v59  ;;  %v420_v2 = vsub.f32 0.0, %v326_v59  ;;  %v330_v4 = vadd.f32 %v329_v62, %v1165_v61 }
 0x1a4   :  { %414 = vst [vmem:[#allocation2 + $0x18] sm:$0xff] %v403_v60  ;;  %v422_v3 = vsub.f32 0.0, %v403_v60  ;;  %v407_v6 = vadd.f32 %v406_v63, %v1165_v61  ;;  %v331_v7 = vpop.f32.mrf.mxu0  ;;  %v408_v8 = vpop.f32.mrf.mxu1 }
 0x1a5   :  { %933 = vpow2.f32 %v423_v0  ;;  %v425_v9 = vmul.f32 1.442695, %v420_v2  ;;  %v332_v11 = vadd.f32 %v331_v7, %v1165_v61  ;;  %415 = vst [vmem:[#allocation2 + $0x20] sm:$0xff] %v330_v4  ;;  %v409_v12 = vadd.f32 %v408_v8, %v1165_v61 }
 0x1a6   :  { %v429_v10 = vmul.f32 1.442695, %v422_v3  ;;  %935 = vpow2.f32 %v427_v1  ;;  %417 = vst [vmem:[#allocation2 + $0x30] sm:$0xff] %v407_v6  ;;  %v534_v13 = vpop.f32.mrf.mxu0  ;;  %v623_v14 = vpop.f32.mrf.mxu1 }
 0x1a7   :  { %937 = vpow2.f32 %v425_v9  ;;  %416 = vst [vmem:[#allocation2 + $0x28] sm:$0xff] %v332_v11  ;;  %418 = vst [vmem:[#allocation2 + $0x38] sm:$0xff] %v409_v12  ;;  %v646_v54 = vmax.f32 %v534_v13, 0.0  ;;  %v648_v55 = vmax.f32 %v623_v14, 0.0 }
 0x1a8   :  { %939 = vpow2.f32 %v429_v10  ;;  %v536_v15 = vpop.f32.mrf.mxu0  ;;  %v625_v16 = vpop.f32.mrf.mxu1 }
 0x1a9   :  { %v647_v52 = vmax.f32 %v536_v15, 0.0  ;;  %v649_v53 = vmax.f32 %v625_v16, 0.0 }
 0x1aa   :  { %v540_v17 = vpop.f32.mrf.mxu0  ;;  %v629_v18 = vpop.f32.mrf.mxu1 }
 0x1ab   :  { %v650_v49 = vmax.f32 %v540_v17, 0.0  ;;  %v652_v51 = vmax.f32 %v629_v18, 0.0 }
 0x1ac   :  { %v542_v19 = vpop.f32.mrf.mxu0  ;;  %v631_v20 = vpop.f32.mrf.mxu1 }
 0x1ad   :  { %v651_v47 = vmax.f32 %v542_v19, 0.0  ;;  %v653_v48 = vmax.f32 %v631_v20, 0.0 }
 0x1ae   :  { %v546_v21 = vpop.f32.mrf.mxu0  ;;  %v635_v22 = vpop.f32.mrf.mxu1 }
 0x1af   :  { %v654_v43 = vmax.f32 %v546_v21, 0.0  ;;  %v656_v46 = vmax.f32 %v635_v22, 0.0 }
 0x1b0   :  { %v548_v23 = vpop.f32.mrf.mxu0  ;;  %v637_v24 = vpop.f32.mrf.mxu1 }
 0x1b1   :  { %v655_v41 = vmax.f32 %v548_v23, 0.0  ;;  %v657_v42 = vmax.f32 %v637_v24, 0.0 }
 0x1b2   :  { %v934_v25 = vpop.eup %933  ;;  %v552_v26 = vpop.f32.mrf.mxu0 }
 0x1b3   :  { %v641_v27 = vpop.f32.mrf.mxu1  ;;  %v936_v28 = vpop.eup %935  ;;  %v431_v29 = vadd.f32 1.0, %v934_v25  ;;  %v658_v39 = vmax.f32 %v552_v26, 0.0 }
 0x1b4   :  { %v938_v30 = vpop.eup %937  ;;  %v433_v31 = vadd.f32 1.0, %v936_v28  ;;  %v554_v32 = vpop.f32.mrf.mxu0  ;;  %v660_v40 = vmax.f32 %v641_v27, 0.0 }
 0x1b5   :  { %v643_v33 = vpop.f32.mrf.mxu1  ;;  %v940_v34 = vpop.eup %939  ;;  %941 = vrcp.f32 %v431_v29  ;;  %v432_v35 = vadd.f32 1.0, %v938_v30  ;;  %v659_v36 = vmax.f32 %v554_v32, 0.0 }
 0x1b6   :  { %v661_v37 = vmax.f32 %v643_v33, 0.0  ;;  %943 = vrcp.f32 %v433_v31  ;;  %v434_v38 = vadd.f32 1.0, %v940_v34 }
 0x1b7   :  { %945 = vrcp.f32 %v432_v35  ;;  %686 = vmatprep.subr.mxu0 %v659_v36 }
 0x1b8   :  { %763 = vmatprep.subr.mxu1 %v661_v37  ;;  %947 = vrcp.f32 %v434_v38  ;;  %687 = vmatpush1.msra.mxu0 %v658_v39 }
 0x1b9   :  { %764 = vmatpush1.msra.mxu1 %v660_v40  ;;  %688 = vmatprep.subr.mxu0 %v655_v41 }
 0x1ba   :  { %765 = vmatprep.subr.mxu1 %v657_v42  ;;  %689 = vmatpush1.msra.mxu0 %v654_v43 }
 0x1bb   :  { %766 = vmatpush1.msra.mxu1 %v656_v46  ;;  %690 = vmatprep.subr.mxu0 %v651_v47 }
 0x1bc   :  { %767 = vmatprep.subr.mxu1 %v653_v48  ;;  %691 = vmatpush1.msra.mxu0 %v650_v49 }
 0x1bd   :  { %768 = vmatpush1.msra.mxu1 %v652_v51  ;;  %692 = vmatprep.subr.mxu0 %v647_v52 }
 0x1be   :  { %769 = vmatprep.subr.mxu1 %v649_v53  ;;  %693 = vmatpush1.msra.mxu0 %v646_v54 }
 0x1bf   :  { %770 = vmatpush1.msra.mxu1 %v648_v55  ;;  %918 = vmatmul.mubr.msk.f32.vlgmr.msra.gmra.mxu0 %vm250_vm1, %v1108_v44 }
 0x1c0   :  { %920 = vmatmul.mubr.msk.f32.vlgmr.msra.gmra.mxu1 %vm250_vm1, %v1108_v44  ;;  %732 = vmatprep.mubr.f32.mxu0 %v1009_v5 }
 0x1c1   :  { %809 = vmatprep.mubr.f32.mxu1 %v1009_v5 }
 0x1c2   :  { %v942_v56 = vpop.eup %941 }
 0x1c3   :  { %v944_v57 = vpop.eup %943  ;;  %v436_v58 = vmul.f32 3.545, %v942_v56  ;;  %919 = vmatmul.mubr.msk.f32.gmra.mxu0 %vm250_vm1, %v1119_v45 }
 0x1c4   :  { %921 = vmatmul.mubr.msk.f32.gmra.mxu1 %vm250_vm1, %v1119_v45  ;;  %v946_v59 = vpop.eup %945  ;;  %v440_v60 = vmul.f32 3.545, %v944_v57 }
 0x1c5   :  { %v948_v62 = vpop.eup %947  ;;  %v902_v63 = vadd.f32 -1.7725, %v436_v58  ;;  %v438_v0 = vmul.f32 3.545, %v946_v59 }
 0x1c6   :  { %v904_v1 = vadd.f32 -1.7725, %v440_v60  ;;  %v442_v44 = vmul.f32 3.545, %v948_v62 }
 0x1c7   :  { %447 = vst [vmem:[#allocation4] sm:$0xff] %v902_v63  ;;  %v903_v2 = vadd.f32 -1.7725, %v438_v0 }
 0x1c8   :  { %449 = vst [vmem:[#allocation4 + $0x10] sm:$0xff] %v904_v1  ;;  %v905_v5 = vadd.f32 -1.7725, %v442_v44 }
 0x1c9   :  { %448 = vst [vmem:[#allocation4 + $0x8] sm:$0xff] %v903_v2 }
 0x1ca   :  { %450 = vst [vmem:[#allocation4 + $0x18] sm:$0xff] %v905_v5 }
 0x27f   :  { %v728_v3 = vpop.f32.mrf.mxu0 }
 0x280   :  { %v805_v4 = vpop.f32.mrf.mxu1  ;;  %v729_v6 = vadd.f32 %v728_v3, %v1159_v50 }
 0x281   :  { %v806_v7 = vadd.f32 %v805_v4, %v1159_v50  ;;  %v730_v45 = vpop.f32.mrf.mxu0 }
 0x282   :  { %v807_v8 = vpop.f32.mrf.mxu1  ;;  %817 = vst [vmem:[#allocation2 + $0x40] sm:$0xff] %v729_v6  ;;  %v825_v9 = vsub.f32 0.0, %v729_v6  ;;  %v731_v11 = vadd.f32 %v730_v45, %v1159_v50 }
 0x283   :  { %819 = vst [vmem:[#allocation2 + $0x50] sm:$0xff] %v806_v7  ;;  %v827_v10 = vsub.f32 0.0, %v806_v7  ;;  %v808_v12 = vadd.f32 %v807_v8, %v1159_v50  ;;  %v734_v13 = vpop.f32.mrf.mxu0 }
 0x284   :  { %v811_v14 = vpop.f32.mrf.mxu1  ;;  %v829_v15 = vmul.f32 1.442695, %v825_v9  ;;  %818 = vst [vmem:[#allocation2 + $0x48] sm:$0xff] %v731_v11  ;;  %v826_v17 = vsub.f32 0.0, %v731_v11  ;;  %v735_v19 = vadd.f32 %v734_v13, %v1165_v61 }
 0x285   :  { %v833_v16 = vmul.f32 1.442695, %v827_v10  ;;  %820 = vst [vmem:[#allocation2 + $0x58] sm:$0xff] %v808_v12  ;;  %v828_v18 = vsub.f32 0.0, %v808_v12  ;;  %v812_v20 = vadd.f32 %v811_v14, %v1165_v61  ;;  %v736_v21 = vpop.f32.mrf.mxu0 }
 0x286   :  { %v813_v22 = vpop.f32.mrf.mxu1  ;;  %949 = vpow2.f32 %v829_v15  ;;  %v831_v23 = vmul.f32 1.442695, %v826_v17  ;;  %v737_v50 = vadd.f32 %v736_v21, %v1165_v61  ;;  %821 = vst [vmem:[#allocation2 + $0x60] sm:$0xff] %v735_v19 }
 0x287   :  { %v835_v24 = vmul.f32 1.442695, %v828_v18  ;;  %951 = vpow2.f32 %v833_v16  ;;  %823 = vst [vmem:[#allocation2 + $0x70] sm:$0xff] %v812_v20  ;;  %v814_v25 = vadd.f32 %v813_v22, %v1165_v61 }
 0x288   :  { %953 = vpow2.f32 %v831_v23  ;;  %822 = vst [vmem:[#allocation2 + $0x68] sm:$0xff] %v737_v50 }
 0x289   :  { %955 = vpow2.f32 %v835_v24  ;;  %824 = vst [vmem:[#allocation2 + $0x78] sm:$0xff] %v814_v25 }
 0x28a   :  { %976 = shalt.err (!%p973_p4)
}
 0x28b   :  { %s1012_s24 = smov 512   ;;  %s1013_s25 = smov 32  }
 0x28c   :  { %869 = dma.vmem_to_hbm [thread:$0]  %s864_s22, 2048, %s1205_s4, [#allocation3], %s1012_s24, %s1012_s24, %s1013_s25  }
 0x28d   :  { %s1014_s4 = smov [#allocation4]  }
 0x28e   :  { %s875_s0 = sshll.u32 %s1014_s4, 4  ;;  %s876_s0 = int_to_ptr.vmem [resolvable:$true] %s875_s0 }
 0x28f   :  { %s985_s28 = scalar_lea.vmem %s876_s0, 1024  ;;  %p990_p6 = scmp.lt.s32.totalorder %s876_s0, %s876_s0 }
 0x290   :  { %p986_p5 = scmp.ne.s32.totalorder %s876_s0, %s985_s28  ;;  %p991_p7 = scmp.lt.s32.totalorder %s985_s28, %s985_s28 }
 0x292   :  { %p992_p8 = por %p991_p7, %p990_p6 }
 0x293   :  { %v950_v61 = vpop.eup %949 }
 0x294   :  { %v952_v26 = vpop.eup %951  ;;  %v837_v27 = vadd.f32 1.0, %v950_v61  ;;  %p993_p9 = pnand %p992_p8, %p986_p5 }
 0x295   :  { %v954_v28 = vpop.eup %953  ;;  %v839_v29 = vadd.f32 1.0, %v952_v26 }
 0x296   :  { %v956_v30 = vpop.eup %955  ;;  %957 = vrcp.f32 %v837_v27  ;;  %v838_v31 = vadd.f32 1.0, %v954_v28 }
 0x297   :  { %959 = vrcp.f32 %v839_v29  ;;  %v840_v32 = vadd.f32 1.0, %v956_v30 }
 0x298   :  { %961 = vrcp.f32 %v838_v31 }
 0x299   :  { %963 = vrcp.f32 %v840_v32 }
 0x2a3   :  { %v958_v33 = vpop.eup %957 }
 0x2a4   :  { %v960_v34 = vpop.eup %959  ;;  %v842_v35 = vmul.f32 3.545, %v958_v33 }
 0x2a5   :  { %v962_v36 = vpop.eup %961  ;;  %v846_v37 = vmul.f32 3.545, %v960_v34 }
 0x2a6   :  { %v964_v38 = vpop.eup %963  ;;  %v922_v39 = vadd.f32 -1.7725, %v842_v35  ;;  %v844_v40 = vmul.f32 3.545, %v962_v36 }
 0x2a7   :  { %v924_v41 = vadd.f32 -1.7725, %v846_v37  ;;  %v848_v42 = vmul.f32 3.545, %v964_v38 }
 0x2a8   :  { %854 = vst [vmem:[#allocation4 + $0x20] sm:$0xff] %v922_v39  ;;  %v923_v43 = vadd.f32 -1.7725, %v844_v40 }
 0x2a9   :  { %856 = vst [vmem:[#allocation4 + $0x30] sm:$0xff] %v924_v41  ;;  %v925_v46 = vadd.f32 -1.7725, %v848_v42 }
 0x2aa   :  { %855 = vst [vmem:[#allocation4 + $0x28] sm:$0xff] %v923_v43 }
 0x2ab   :  { %857 = vst [vmem:[#allocation4 + $0x38] sm:$0xff] %v925_v46 }
 0x2ac   :  { %996 = shalt.err (!%p993_p9)
}
 0x2ad   :  { %881 = dma.vmem_to_hbm [thread:$0]  %s876_s0, 1024, %s1206_s5, [#allocation5], %s1012_s24, %s1012_s24, %s1013_s25  }
 0x2ae   :  { %1005 = dma.done.wait [#allocation3], 2048  }
 0x2af   :  { %1006 = vsyncadd [#allocation3], 4294965248 }
 0x2b0   :  { %1007 = dma.done.wait [#allocation5], 1024  }
 0x2b1   :  { %1008 = vsyncadd [#allocation5], 4294966272 }
 0x2b2   :  { %888 = vsyncpa [#allocation3], 1 }
 0x2b3   :  { %889 = vsyncpa [#allocation5], 1 }

</bundles_post_ra>
